<compile_context>
chip_gen: v7x
topology: tpu7x:2x2x1
jax: 0.10.0
libtpu: 0.0.40
codegen_flags: <defaults>
</compile_context>

<pallas_src>
import jax
import jax.numpy as jnp
from jax import lax
from jax.experimental import pallas as pl
from jax.experimental.pallas import tpu as pltpu


def _elastic_kernel(ah_ref, awc_ref, ident_ref, x_ref, o_ref):
    """One grid step = KB batch planes, both channels interleaved on lanes.

    ah_ref    : VMEM (H, H)       H-axis Gaussian band matrix (shared by channels)
    awc_ref   : VMEM (WC, WC)     kron(W-axis band, diag(2*alpha)) right matrix
    ident_ref : VMEM (H, WC)      identity grid, already rescaled to (-1, 1)
    x_ref     : VMEM (KB, H, WC)  raw offset planes, channel-interleaved lanes
    o_ref     : VMEM (KB, H, WC)  output position grid
    """
    kb, h, wc = x_ref.shape
    ah = ah_ref[...]
    awc = awc_ref[...]
    ident = ident_ref[...]

    # W-axis blur (+ per-channel 2*alpha fold) for all KB planes in one matmul.
    # Leading-dim collapse (KB,H,WC)->(KB*H,WC) keeps the (sublane,lane) layout.
    t = jnp.dot(x_ref[...].reshape(kb * h, wc), awc,
                preferred_element_type=jnp.float32).reshape(kb, h, wc)

    # H-axis blur per plane, then add the rescaled identity grid.
    # kb is a small static constant -> statically unrolled loop.
    for k in range(kb):
        o_ref[k] = jnp.dot(ah, t[k], preferred_element_type=jnp.float32) + ident


def elastic_grid_pallas(offset_grid, alpha, sigma, kernel_size):
    """offset_grid: (B, H, W, 2) f32 raw offsets in [-1, 1).
    Returns pos_grid: (B, H, W, 2) f32 in grid_sample range [-1, 1]."""
    B, H, W, C = offset_grid.shape
    assert C == 2, "this Pallas ElasticGrid kernel implements ndim == 2"
    K = int(kernel_size)
    pad = K // 2
    WC = W * C

    # Free reshape (collapses the two trailing dims) - no transpose, no pad.
    x = offset_grid.astype(jnp.float32).reshape(B, H, WC)

    # ---- Gaussian taps (shared by both channels) and band matrices ----------
    def gauss1d(s):
        t = jnp.arange(K, dtype=jnp.float32) - (K - 1) / 2.0
        g = jnp.exp(-(t * t) / (2.0 * s * s))
        return g / jnp.sum(g)

    sigma_v = jnp.broadcast_to(jnp.asarray(sigma, jnp.float32), (2,))
    alpha_v = jnp.broadcast_to(jnp.asarray(alpha, jnp.float32), (C,))
    gh, gw = gauss1d(sigma_v[0]), gauss1d(sigma_v[1])

    def band(g, n):
        # out[i] = sum_m band[i, m] * x[m]  ==  zero-padded 'same' 1-D conv
        i = jnp.arange(n)
        idx = i[None, :] - i[:, None] + pad            # (m - i + pad)
        valid = (idx >= 0) & (idx < K)
        return jnp.where(valid, g[jnp.clip(idx, 0, K - 1)], 0.0).astype(jnp.float32)

    Ah = band(gh, H)                                           # (H, H), left multiply
    # Channel-preserving W-blur right matrix with 2*alpha[c] folded per channel.
    Awc = jnp.kron(band(gw, W).T, jnp.diag(2.0 * alpha_v))     # (WC, WC)

    # ---- identity grid, channel-interleaved, already rescaled to (-1, 1) ----
    ih = jnp.arange(H, dtype=jnp.float32) / max(H - 1, 1)
    iw = jnp.arange(W, dtype=jnp.float32) / max(W - 1, 1)
    ident = jnp.stack([jnp.broadcast_to(ih[:, None], (H, W)),
                       jnp.broadcast_to(iw[None, :], (H, W))], axis=-1)  # (H,W,2)
    ident2 = (ident * 2.0 - 1.0).reshape(H, WC)

    # ---- block sizing: KB planes per step (~1 MiB blocks, bounded unroll) ----
    plane_bytes = H * WC * 4
    kb_target = max(1, min(64, (1 << 20) // plane_bytes))
    kb_limit = max(1, min(B, kb_target, B // 2 if B >= 2 else 1))
    KB = 1
    for d in range(kb_limit, 0, -1):        # largest divisor of B <= kb_limit
        if B % d == 0:
            KB = d
            break
    nsteps = B // KB

    def run(buffered_constants):
        const_kw = ({"pipeline_mode": pl.Buffered(1)} if buffered_constants else {})
        call = pl.pallas_call(
            _elastic_kernel,
            out_shape=jax.ShapeDtypeStruct((B, H, WC), jnp.float32),
            grid=(nsteps,),
            in_specs=[
                pl.BlockSpec((H, H), lambda b: (0, 0), **const_kw),     # Ah
                pl.BlockSpec((WC, WC), lambda b: (0, 0), **const_kw),   # Awc
                pl.BlockSpec((H, WC), lambda b: (0, 0), **const_kw),    # ident
                pl.BlockSpec((KB, H, WC), lambda b: (b, 0, 0)),         # offsets
            ],
            out_specs=pl.BlockSpec((KB, H, WC), lambda b: (b, 0, 0)),
            compiler_params=pltpu.CompilerParams(
                dimension_semantics=("parallel",),
                vmem_limit_bytes=32 * 1024 * 1024,
            ),
        )
        return jax.block_until_ready(call(Ah, Awc, ident2, x))

    try:
        out = run(True)
    except Exception:
        # Single-buffer hint unsupported on this JAX/Mosaic build -> default
        # double buffering (constants are tiny, so this is only a minor loss).
        out = run(False)

    return out.reshape(B, H, W, C)          # free reshape back to (B, H, W, C)


def _reference(offset_grid, alpha, sigma, kernel_size):
    """Plain-JAX reference of the same forward pass (shift-MAC + zero pad)."""
    B, H, W, C = offset_grid.shape
    K = int(kernel_size)
    pad = K // 2
    x = jnp.transpose(offset_grid, (0, 3, 1, 2)).reshape(B * C, H, W)
    x = jnp.pad(x, ((0, 0), (pad, pad), (pad, pad)))

    def gauss1d(s):
        t = jnp.arange(K, dtype=jnp.float32) - (K - 1) / 2.0
        g = jnp.exp(-(t * t) / (2.0 * s * s))
        return g / jnp.sum(g)

    sigma = jnp.broadcast_to(jnp.asarray(sigma, jnp.float32), (2,))
    gh, gw = gauss1d(sigma[0]), gauss1d(sigma[1])

    tmp = sum(gw[k] * x[:, :, k:k + W] for k in range(K))
    acc = sum(gh[k] * tmp[:, k:k + H, :] for k in range(K))
    mov = acc.reshape(B, C, H, W) * jnp.broadcast_to(
        jnp.asarray(alpha, jnp.float32), (C,))[None, :, None, None]
    ih = jnp.arange(H, dtype=jnp.float32)[:, None] / max(H - 1, 1)
    iw = jnp.arange(W, dtype=jnp.float32)[None, :] / max(W - 1, 1)
    ident = jnp.stack([jnp.broadcast_to(ih, (H, W)),
                       jnp.broadcast_to(iw, (H, W))], axis=0)
    pos = (mov + ident[None]) * 2.0 - 1.0
    return jnp.transpose(pos, (0, 2, 3, 1))


if __name__ == "__main__":
    # ElasticGrid(ndim=2, alpha=(0.05, 0.08), sigma=3.0, kernel_size=11)
    ndim = 2
    B, H, W = 2, 16, 16
    alpha = (0.05, 0.08)
    sigma = 3.0
    kernel_size = 11

    key = jax.random.PRNGKey(0)
    # _generate_raw_grid: torch.rand(...) * 2 - 1
    offset_grid = jax.random.uniform(key, (B, H, W, ndim), jnp.float32) * 2.0 - 1.0

    pos_grid = elastic_grid_pallas(offset_grid, alpha, sigma, kernel_size)
    pos_grid = jax.block_until_ready(pos_grid)

    ref = _reference(offset_grid, alpha, sigma, kernel_size)
    assert pos_grid.shape == (B, H, W, ndim)
    # Default (single-pass) MXU precision -> tolerance loosened vs. HIGHEST.
    assert jnp.allclose(pos_grid, ref, rtol=5e-3, atol=5e-3), float(
        jnp.max(jnp.abs(pos_grid - ref)))

    print("KERNEL_OK")
</pallas_src>

<mosaic_0001>
module attributes {stable_mosaic.version = 11 : i64} {
  func.func @_elastic_kernel(%arg0: i32, %arg1: memref<16x16xf32, #tpu.memory_space<vmem>>, %arg2: memref<32x32xf32, #tpu.memory_space<vmem>>, %arg3: memref<16x32xf32, #tpu.memory_space<vmem>>, %arg4: memref<1x16x32xf32, #tpu.memory_space<vmem>>, %arg5: memref<1x16x32xf32, #tpu.memory_space<vmem>>) attributes {dimension_semantics = [#tpu.dimension_semantics<parallel>], iteration_bounds = array<i64: 2>, scalar_prefetch = 0 : i64, scratch_operands = 0 : i64, tpu.core_type = #tpu.core_type<tc>, window_params = [{pipeline_mode = #tpu.pipeline_mode<synchronous>, transform_indices = @transform_0, window_bounds = array<i64: 16, 16>}, {pipeline_mode = #tpu.pipeline_mode<synchronous>, transform_indices = @transform_1, window_bounds = array<i64: 32, 32>}, {pipeline_mode = #tpu.pipeline_mode<synchronous>, transform_indices = @transform_2, window_bounds = array<i64: 16, 32>}, {transform_indices = @transform_3, window_bounds = array<i64: 1, 16, 32>}, {transform_indices = @transform_4, window_bounds = array<i64: 1, 16, 32>}]} {
    %c0 = arith.constant 0 : index
    %c0_0 = arith.constant 0 : index
    %0 = vector.load %arg1[%c0, %c0_0] : memref<16x16xf32, #tpu.memory_space<vmem>>, vector<16x16xf32>
    %c0_1 = arith.constant 0 : index
    %c0_2 = arith.constant 0 : index
    %1 = vector.load %arg2[%c0_1, %c0_2] : memref<32x32xf32, #tpu.memory_space<vmem>>, vector<32x32xf32>
    %c0_3 = arith.constant 0 : index
    %c0_4 = arith.constant 0 : index
    %2 = vector.load %arg3[%c0_3, %c0_4] : memref<16x32xf32, #tpu.memory_space<vmem>>, vector<16x32xf32>
    %c0_5 = arith.constant 0 : index
    %c0_6 = arith.constant 0 : index
    %c0_7 = arith.constant 0 : index
    %3 = vector.load %arg4[%c0_5, %c0_6, %c0_7] : memref<1x16x32xf32, #tpu.memory_space<vmem>>, vector<1x16x32xf32>
    %4 = vector.shape_cast %3 : vector<1x16x32xf32> to vector<16x32xf32>
    %cst = arith.constant dense<0.000000e+00> : vector<16x32xf32>
    %5 = tpu.matmul %4, %1, %cst {dimension_numbers = #tpu.dot_dimension_numbers<[1], [0], [0], [1], [0, 0, 1, 1], [], []>} : vector<16x32xf32>, vector<32x32xf32>, vector<16x32xf32> -> vector<16x32xf32>
    %6 = vector.shape_cast %5 : vector<16x32xf32> to vector<1x16x32xf32>
    %7 = vector.shape_cast %6 : vector<1x16x32xf32> to vector<16x32xf32>
    %cst_8 = arith.constant dense<0.000000e+00> : vector<16x32xf32>
    %8 = tpu.matmul %0, %7, %cst_8 {dimension_numbers = #tpu.dot_dimension_numbers<[1], [0], [0], [1], [0, 0, 1, 1], [], []>} : vector<16x16xf32>, vector<16x32xf32>, vector<16x32xf32> -> vector<16x32xf32>
    %9 = arith.addf %8, %2 : vector<16x32xf32>
    %c0_9 = arith.constant 0 : index
    %c0_10 = arith.constant 0 : index
    %c0_11 = arith.constant 0 : index
    %10 = vector.load %arg5[%c0_9, %c0_10, %c0_11] : memref<1x16x32xf32, #tpu.memory_space<vmem>>, vector<1x16x32xf32>
    %11 = vector.shape_cast %10 : vector<1x16x32xf32> to vector<16x32xf32>
    %12 = vector.shape_cast %9 : vector<16x32xf32> to vector<1x16x32xf32>
    tpu.vector_store %arg5[%c0_9, %c0_10, %c0_11], %12 {strides = array<i32>} : memref<1x16x32xf32, #tpu.memory_space<vmem>>, vector<1x16x32xf32>,
    return
  }
  func.func @transform_0(%arg0: i32) -> (i32, i32) {
    %c0_i32 = arith.constant 0 : i32
    %c0_i32_0 = arith.constant 0 : i32
    %c0_i32_1 = arith.constant 0 : i32
    return %c0_i32, %c0_i32_0 : i32, i32
  }
  func.func @transform_1(%arg0: i32) -> (i32, i32) {
    %c0_i32 = arith.constant 0 : i32
    %c0_i32_0 = arith.constant 0 : i32
    %c0_i32_1 = arith.constant 0 : i32
    return %c0_i32, %c0_i32_0 : i32, i32
  }
  func.func @transform_2(%arg0: i32) -> (i32, i32) {
    %c0_i32 = arith.constant 0 : i32
    %c0_i32_0 = arith.constant 0 : i32
    %c0_i32_1 = arith.constant 0 : i32
    return %c0_i32, %c0_i32_0 : i32, i32
  }
  func.func @transform_3(%arg0: i32) -> (i32, i32, i32) {
    %c0_i32 = arith.constant 0 : i32
    %c0_i32_0 = arith.constant 0 : i32
    %c0_i32_1 = arith.constant 0 : i32
    return %arg0, %c0_i32, %c0_i32_0 : i32, i32, i32
  }
  func.func @transform_4(%arg0: i32) -> (i32, i32, i32) {
    %c0_i32 = arith.constant 0 : i32
    %c0_i32_0 = arith.constant 0 : i32
    %c0_i32_1 = arith.constant 0 : i32
    return %arg0, %c0_i32, %c0_i32_0 : i32, i32, i32
  }
}

module attributes {stable_mosaic.version = 11 : i64} {
  func.func @_elastic_kernel(%arg0: i32, %arg1: memref<16x16xf32, #tpu.memory_space<vmem>>, %arg2: memref<32x32xf32, #tpu.memory_space<vmem>>, %arg3: memref<16x32xf32, #tpu.memory_space<vmem>>, %arg4: memref<1x16x32xf32, #tpu.memory_space<vmem>>, %arg5: memref<1x16x32xf32, #tpu.memory_space<vmem>>) attributes {dimension_semantics = [#tpu.dimension_semantics<parallel>], iteration_bounds = array<i64: 2>, scalar_prefetch = 0 : i64, scratch_operands = 0 : i64, tpu.core_type = #tpu.core_type<tc>, window_params = [{pipeline_mode = #tpu.pipeline_mode<synchronous>, transform_indices = @transform_0, window_bounds = array<i64: 16, 16>}, {pipeline_mode = #tpu.pipeline_mode<synchronous>, transform_indices = @transform_1, window_bounds = array<i64: 32, 32>}, {pipeline_mode = #tpu.pipeline_mode<synchronous>, transform_indices = @transform_2, window_bounds = array<i64: 16, 32>}, {transform_indices = @transform_3, window_bounds = array<i64: 1, 16, 32>}, {transform_indices = @transform_4, window_bounds = array<i64: 1, 16, 32>}]} {
    %c0 = arith.constant 0 : index
    %c0_0 = arith.constant 0 : index
    %0 = vector.load %arg1[%c0, %c0_0] : memref<16x16xf32, #tpu.memory_space<vmem>>, vector<16x16xf32>
    %c0_1 = arith.constant 0 : index
    %c0_2 = arith.constant 0 : index
    %1 = vector.load %arg2[%c0_1, %c0_2] : memref<32x32xf32, #tpu.memory_space<vmem>>, vector<32x32xf32>
    %c0_3 = arith.constant 0 : index
    %c0_4 = arith.constant 0 : index
    %2 = vector.load %arg3[%c0_3, %c0_4] : memref<16x32xf32, #tpu.memory_space<vmem>>, vector<16x32xf32>
    %c0_5 = arith.constant 0 : index
    %c0_6 = arith.constant 0 : index
    %c0_7 = arith.constant 0 : index
    %3 = vector.load %arg4[%c0_5, %c0_6, %c0_7] : memref<1x16x32xf32, #tpu.memory_space<vmem>>, vector<1x16x32xf32>
    %4 = vector.shape_cast %3 : vector<1x16x32xf32> to vector<16x32xf32>
    %cst = arith.constant dense<0.000000e+00> : vector<16x32xf32>
    %5 = tpu.matmul %4, %1, %cst {dimension_numbers = #tpu.dot_dimension_numbers<[1], [0], [0], [1], [0, 0, 1, 1], [], []>} : vector<16x32xf32>, vector<32x32xf32>, vector<16x32xf32> -> vector<16x32xf32>
    %6 = vector.shape_cast %5 : vector<16x32xf32> to vector<1x16x32xf32>
    %7 = vector.shape_cast %6 : vector<1x16x32xf32> to vector<16x32xf32>
    %cst_8 = arith.constant dense<0.000000e+00> : vector<16x32xf32>
    %8 = tpu.matmul %0, %7, %cst_8 {dimension_numbers = #tpu.dot_dimension_numbers<[1], [0], [0], [1], [0, 0, 1, 1], [], []>} : vector<16x16xf32>, vector<16x32xf32>, vector<16x32xf32> -> vector<16x32xf32>
    %9 = arith.addf %8, %2 : vector<16x32xf32>
    %c0_9 = arith.constant 0 : index
    %c0_10 = arith.constant 0 : index
    %c0_11 = arith.constant 0 : index
    %10 = vector.load %arg5[%c0_9, %c0_10, %c0_11] : memref<1x16x32xf32, #tpu.memory_space<vmem>>, vector<1x16x32xf32>
    %11 = vector.shape_cast %10 : vector<1x16x32xf32> to vector<16x32xf32>
    %12 = vector.shape_cast %9 : vector<16x32xf32> to vector<1x16x32xf32>
    tpu.vector_store %arg5[%c0_9, %c0_10, %c0_11], %12 {strides = array<i32>} : memref<1x16x32xf32, #tpu.memory_space<vmem>>, vector<1x16x32xf32>,
    return
  }
  func.func @transform_0(%arg0: i32) -> (i32, i32) {
    %c0_i32 = arith.constant 0 : i32
    %c0_i32_0 = arith.constant 0 : i32
    %c0_i32_1 = arith.constant 0 : i32
    return %c0_i32, %c0_i32_0 : i32, i32
  }
  func.func @transform_1(%arg0: i32) -> (i32, i32) {
    %c0_i32 = arith.constant 0 : i32
    %c0_i32_0 = arith.constant 0 : i32
    %c0_i32_1 = arith.constant 0 : i32
    return %c0_i32, %c0_i32_0 : i32, i32
  }
  func.func @transform_2(%arg0: i32) -> (i32, i32) {
    %c0_i32 = arith.constant 0 : i32
    %c0_i32_0 = arith.constant 0 : i32
    %c0_i32_1 = arith.constant 0 : i32
    return %c0_i32, %c0_i32_0 : i32, i32
  }
  func.func @transform_3(%arg0: i32) -> (i32, i32, i32) {
    %c0_i32 = arith.constant 0 : i32
    %c0_i32_0 = arith.constant 0 : i32
    %c0_i32_1 = arith.constant 0 : i32
    return %arg0, %c0_i32, %c0_i32_0 : i32, i32, i32
  }
  func.func @transform_4(%arg0: i32) -> (i32, i32, i32) {
    %c0_i32 = arith.constant 0 : i32
    %c0_i32_0 = arith.constant 0 : i32
    %c0_i32_1 = arith.constant 0 : i32
    return %arg0, %c0_i32, %c0_i32_0 : i32, i32, i32
  }
}

</mosaic_0001>

<bundles_post_ra>
// kernel: tpu_custom_call.1
= control target key start
LH: loop header
LB: loop body
LE: loop exit
PB: predicated region body
PF: predicated region fallthrough
CT: control target
= control target key end

     0   :  { %9 = vsyncpa [#allocation3], 0  ;;  %s1200_s0 = inlined_call_operand.hbm [shape: f32[16,16], index: 0, kind: input, shape index: {}]   ;;  %s1201_s1 = inlined_call_operand.hbm [shape: f32[32,32], index: 1, kind: input, shape index: {}]   ;;  %s1202_s2 = inlined_call_operand.hbm [shape: f32[16,32], index: 2, kind: input, shape index: {}]   ;;  %s1203_s3 = inlined_call_operand.hbm [shape: f32[2,16,32], index: 3, kind: input, shape index: {}]   ;;  %s1204_s4 = inlined_call_operand.hbm [shape: f32[2,16,32], index: 4, kind: output, shape index: {}]  }
   0x1   :  { %10 = vsyncpa [#allocation6], 0 }
   0x2   :  { %11 = vsyncpa [#allocation9], 0 }
   0x3   :  { %13 = vsyncpa [#allocation9 + $0x1], 0 }
   0x4   :  { %14 = vsyncpa [#allocation4], 0 }
   0x5   :  { %16 = vsyncpa [#allocation4 + $0x1], 0  ;;  %s925_s15 = smov 0   ;;  %s927_s16 = smov 0  }
   0x6   :  { %s929_s17 = smov 0   ;;  %s931_s18 = smov 0  }
   0x7 LB: > { %s946_s19 = sadd.s32 4294967295, %s889_s18   ;;  %s554_s20 = sadd.s32 4294967294, %s889_s18   ;;  %s889_s18 = sphi %s931_s18, %s1227_s18   ;;  %s885_s17 = sphi %s929_s17, %s1226_s17   ;;  %s881_s16 = sphi %s927_s16, %s1225_s16   ;;  %s877_s15 = sphi %s925_s15, %s1224_s15  }
   0x8   : > { %p105_p0 = scmp.ne.s32.totalorder %s881_s16, %s877_s15  ;;  %p1205_p1 = scmp.eq.s32.totalorder %s946_s19, 0 }
   0x9   : > { %p135_p3 = scmp.eq.s32.totalorder %s554_s20, 1  ;;  %p555_p5 = scmp.ge.s32.totalorder %s889_s18, 1 }
   0xa   : > { %p955_p4 = por %p1205_p1, %p105_p0  ;;  %p142_p7 = scmp.lt.s32.totalorder %s889_s18, 3 }
   0xb   : > { %p960_p6 = por %p135_p3, %p105_p0  ;;  %s891_s24 = smov [#allocation5]  }
   0xc   : > { %s1208_s21 = scalar_select %p955_p4, 1, 0 }
   0xd   : > { %s1209_s22 = scalar_select %p960_p6, 1, 0 }
   0xe   : > { %p965_p8 = pnand %p555_p5, %p142_p7  ;;  %s167_s25 = sshll.u32 %s891_s24, 4  ;;  %s972_s25 = int_to_ptr.vmem [resolvable:$true] %s167_s25 }
   0xf   : > { %s892_s27 = smov [#allocation2]   ;;  %s893_s29 = smov [#allocation7]  }
  0x10   : > { %s1210_s23 = scalar_select %p965_p8, 1, 0 }
  0x11   : > { %p636_p10 = pneg %p965_p8  ;;  %s154_s28 = sshll.u32 %s892_s27, 4  ;;  %s980_s28 = int_to_ptr.vmem [resolvable:$true] %s154_s28 }
  0x12   : > { %s982_s30 = sshll.u32 %s893_s29, 4  ;;  %s701_s7 = scalar_lea.hbm %s1201_s1, 512  ;;  %s181_s30 = int_to_ptr.vmem [resolvable:$true] %s982_s30 }
  0x13   : > { %p976_p11 = pnand %p636_p10, %p1205_p1  ;;  %p702_p12 = scmp.ne.s32.totalorder %s1201_s1, %s701_s7 }
  0x14   : > { %p708_p5 = scmp.lt.u32.totalorder %s701_s7, %s1201_s1 }
  0x15   : > { %p992_p13 = pneg %p976_p11 }
  0x17   : > { %p704_p0 = pnand %p992_p13, %p702_p12 }
  0x19   : > { %p705_p3 = pneg %p704_p0 }
  0x1b   : > { %p710_p7 = pnand %p708_p5, %p705_p3 }
  0x1d   : > { %713 = shalt.err (!%p710_p7)
}
  0x1e   : > { %s714_s13 = scalar_lea.vmem %s972_s25, 512  ;;  %p722_p2 = scmp.lt.s32.totalorder %s972_s25, %s972_s25 }
  0x1f   : > { %p715_p10 = scmp.ne.s32.totalorder %s972_s25, %s714_s13  ;;  %p723_p6 = scmp.lt.s32.totalorder %s714_s13, %s714_s13 }
  0x21   : > { %p717_p9 = pnand %p715_p10, %p992_p13  ;;  %p724_p12 = por %p723_p6, %p722_p2 }
  0x23   : > { %p718_p1 = pneg %p717_p9 }
  0x25   : > { %p725_p0 = pnand %p724_p12, %p718_p1 }
  0x27   : > { %728 = shalt.err (!%p725_p0)
}
  0x28   : > { %s894_s14 = smov 128   ;;  %s895_s20 = smov 8  }
  0x29   : > { %642 = dma.hbm_to_vmem [thread:$0]  (!%p976_p11), %s1201_s1, 512, %s972_s25, [#allocation6], %s894_s14, %s894_s14, %s895_s20  }
  0x2a   : > { %s729_s6 = scalar_lea.hbm %s1200_s0, 256 }
  0x2b   : > { %p730_p1 = scmp.ne.s32.totalorder %s1200_s0, %s729_s6  ;;  %p736_p9 = scmp.lt.u32.totalorder %s729_s6, %s1200_s0 }
  0x2d   : > { %p732_p2 = pnand %p730_p1, %p992_p13 }
  0x2f   : > { %p733_p6 = pneg %p732_p2 }
  0x31   : > { %p738_p3 = pnand %p736_p9, %p733_p6 }
  0x33   : > { %741 = shalt.err (!%p738_p3)
}
  0x34   : > { %s742_s25 = scalar_lea.vmem %s980_s28, 256  ;;  %p750_p12 = scmp.lt.s32.totalorder %s980_s28, %s980_s28 }
  0x35   : > { %p743_p5 = scmp.ne.s32.totalorder %s980_s28, %s742_s25  ;;  %p751_p0 = scmp.lt.s32.totalorder %s742_s25, %s742_s25 }
  0x37   : > { %p745_p7 = pnand %p743_p5, %p992_p13  ;;  %p752_p1 = por %p751_p0, %p750_p12 }
  0x39   : > { %p746_p10 = pneg %p745_p7 }
  0x3b   : > { %p753_p2 = pnand %p752_p1, %p746_p10 }
  0x3d   : > { %756 = shalt.err (!%p753_p2)
}
  0x3e   : > { %639 = dma.hbm_to_vmem [thread:$0]  (!%p976_p11), %s1200_s0, 256, %s980_s28, [#allocation3], %s894_s14, %s894_s14, %s895_s20  }
  0x3f   : > { %s757_s29 = scalar_lea.hbm %s1202_s2, 256 }
  0x40   : > { %p758_p6 = scmp.ne.s32.totalorder %s1202_s2, %s757_s29  ;;  %p764_p5 = scmp.lt.u32.totalorder %s757_s29, %s1202_s2 }
  0x42   : > { %p760_p9 = pnand %p758_p6, %p992_p13 }
  0x44   : > { %p761_p3 = pneg %p760_p9 }
  0x46   : > { %p766_p7 = pnand %p764_p5, %p761_p3 }
  0x48   : > { %769 = shalt.err (!%p766_p7)
}
  0x49   : > { %s770_s9 = scalar_lea.vmem %s181_s30, 256  ;;  %p778_p1 = scmp.lt.s32.totalorder %s181_s30, %s181_s30 }
  0x4a   : > { %p771_p10 = scmp.ne.s32.totalorder %s181_s30, %s770_s9  ;;  %p779_p2 = scmp.lt.s32.totalorder %s770_s9, %s770_s9 }
  0x4c   : > { %p773_p12 = pnand %p771_p10, %p992_p13  ;;  %p780_p4 = por %p779_p2, %p778_p1 }
  0x4e   : > { %p774_p0 = pneg %p773_p12 }
  0x50   : > { %p781_p8 = pnand %p780_p4, %p774_p0 }
  0x52   : > { %784 = shalt.err (!%p781_p8)
}
  0x53   : > { %645 = dma.hbm_to_vmem [thread:$0]  (!%p976_p11), %s1202_s2, 256, %s181_s30, [#allocation6], %s894_s14, %s894_s14, %s895_s20  }
  0x54   : > { %s1065_s10 = sadd.s32 1, %s889_s18   ;;  %s92_s25 = sadd.s32 1, %s885_s17 }
  0x55   : > { %s89_s26 = ssub.s32 %s889_s18, %s1065_s10  ;;  %p99_p8 = scmp.ne.s32.totalorder %s885_s17, %s881_s16 }
  0x56   : > { %p90_p4 = scmp.eq.s32.totalorder %s89_s26, 0  ;;  %p100_p13 = scmp.eq.s32.totalorder %s889_s18, 0 }
  0x57   : > { %p657_p6 = scmp.lt.s32.totalorder %s889_s18, 2  ;;  %p1213_p3 = scmp.eq.s32.totalorder %s946_s19, 1 }
  0x58   : > { %s1075_s12 = scalar_select %p90_p4, %s885_s17, %s92_s25  }
  0x59   : > { %p101_p9 = por %p100_p13, %p99_p8  ;;  %p1079_p5 = por %p1213_p3, %p99_p8 }
  0x5a   : > { %s194_s24 = sand.u32 1, %s885_s17   ;;  %s578_s27 = sshll.u32 %s889_s18, 8 }
  0x5b   : > { %s560_s30 = sshll.u32 %s194_s24, 4  ;;  %s1088_s6 = scalar_lea.hbm %s1203_s3, %s578_s27 }
  0x5c   : > { %s198_s7 = scalar_lea.vmem [#allocation8], %s560_s30  ;;  %p1090_p11 = pnand %p657_p6, %p101_p9 }
  0x5d   : > { %s205_s8 = sshll.u32 %s198_s7, 4  ;;  %s1096_s28 = scalar_lea.sflag [#allocation9], %s194_s24  ;;  %s1094_s8 = int_to_ptr.vmem [resolvable:$true] %s205_s8 }
  0x5e   : > { %s785_s11 = scalar_lea.hbm %s1088_s6, 256  ;;  %p787_p10 = pneg %p1090_p11 }
  0x5f   : > { %p786_p7 = scmp.ne.s32.totalorder %s1088_s6, %s785_s11  ;;  %s790_s27 = scalar_lea.hbm %s1203_s3, 512 }
  0x60   : > { %p791_p1 = scmp.lt.u32.totalorder %s1088_s6, %s1203_s3  ;;  %p792_p2 = scmp.lt.u32.totalorder %s790_s27, %s785_s11 }
  0x61   : > { %p788_p12 = pnand %p787_p10, %p786_p7  ;;  %p794_p8 = scmp.lt.u32.totalorder %s785_s11, %s1088_s6 }
  0x62   : > { %p793_p4 = por %p792_p2, %p791_p1 }
  0x63   : > { %p789_p0 = pneg %p788_p12 }
  0x64   : > { %p795_p13 = por %p794_p8, %p793_p4 }
  0x66   : > { %p796_p6 = pnand %p795_p13, %p789_p0 }
  0x68   : > { %799 = shalt.err (!%p796_p6)
}
  0x69   : > { %s800_s24 = scalar_lea.vmem %s1094_s8, 256  ;;  %s896_s5 = smov [#allocation8]  }
  0x6a   : > { %p801_p9 = scmp.ne.s32.totalorder %s1094_s8, %s800_s24  ;;  %s805_s7 = sshll.u32 %s896_s5, 4  ;;  %s806_s7 = int_to_ptr.vmem [resolvable:$false] %s805_s7 }
  0x6b   : > { %s807_s26 = scalar_lea.vmem %s806_s7, 512  ;;  %p808_p12 = scmp.lt.s32.totalorder %s1094_s8, %s806_s7 }
  0x6c   : > { %p803_p3 = pnand %p801_p9, %p787_p10  ;;  %p809_p1 = scmp.lt.s32.totalorder %s807_s26, %s800_s24 }
  0x6e   : > { %p804_p7 = pneg %p803_p3  ;;  %p810_p2 = por %p809_p1, %p808_p12 }
  0x70   : > { %p811_p4 = pnand %p810_p2, %p804_p7 }
  0x72   : > { %814 = shalt.err (!%p811_p4)
}
  0x73   : > { %649 = dma.hbm_to_vmem [thread:$0]  (!%p1090_p11), %s1088_s6, 256, %s1094_s8, %s1096_s28, %s894_s14, %s894_s14, %s895_s20  }
  0x74   : > { %p1216_p10 = scmp.ne.s32.totalorder %s1210_s23, 0 }
  0x75   : > { %p1217_p0 = scmp.eq.s32.totalorder (!%p1216_p10), %s946_s19, 0 }
  0x76   : > { %217 = sbr.rel (%p1216_p10) target bundleno = 593 (0x251), region = 36 }
  0x7d   : > { %860 = dma.done.wait (%p1217_p0), [#allocation3], 256   ;;  %p1218_p8 = pmov %p1217_p0 }
  0x7e   : > { %p1219_p13 = pmov %p1217_p0 }
  0x7f   : > { %862 = vsyncadd (%p1218_p8), [#allocation3], 4294967040 }
  0x80   : > { %864 = dma.done.wait (%p1219_p13), [#allocation6], 768   ;;  %p1220_p6 = pmov %p1217_p0 }
  0x81   : > { %s1138_s9 = sand.u32 1, %s881_s16   ;;  %p1221_p11 = scmp.ne.s32.totalorder %s1208_s21, 0 }
  0x82   : > { %866 = vsyncadd (%p1220_p6), [#allocation6], 4294966528  ;;  %s567_s23 = sshll.u32 %s1138_s9, 4  ;;  %s232_s14 = scalar_lea.sflag [#allocation9], %s1138_s9 }
  0x83   : > { %s235_s20 = scalar_lea.vmem [#allocation8], %s567_s23 }
  0x84   : > { %868 = dma.done.wait (%p1221_p11), %s232_s14, 256  }
  0x85   : > { %870 = vsyncadd (%p1221_p11), %s232_s14, 4294967040  ;;  %vm270_vm0 = vcmask 261120   ;;  %v262_v0 = vld [vmem:[#allocation5] sm:$0xff]  ;;  %v263_v1 = vld [vmem:[#allocation5 + $0x8] sm:$0xff]  ;;  %vm352_vm1 = vcmask 130048   ;;  %s259_s21 = scalar_lea.vmem [#allocation10], %s567_s23 }
  0x86   : > { %v264_v2 = vld [vmem:[#allocation5 + $0x10] sm:$0xff]  ;;  %v608_v3 = vpack.c.bf16 %v263_v1, %v262_v0  ;;  %v265_v4 = vld [vmem:[#allocation5 + $0x18] sm:$0xff]  ;;  %s450_s6 = sshll.u32 %s259_s21, 4  ;;  %v267_v13 = vld [vmem:[#allocation7 + $0x8] sm:$0xff]  ;;  %s579_s8 = sshll.u32 %s946_s19, 8  ;;  %s1149_s6 = int_to_ptr.vmem [resolvable:$true] %s450_s6 }
  0x87   : > { %v268_v5 = vld [vmem:[%s235_s20] sm:$0xff]  ;;  %v612_v6 = vpack.c.bf16 %v265_v4, %v264_v2  ;;  %v269_v7 = vld [vmem:[%s235_s20 + $0x8] sm:$0xff]  ;;  %s1154_s25 = scalar_lea.hbm %s1204_s4, %s579_s8  ;;  %s437_s19 = scalar_lea.sflag [#allocation4], %s1138_s9 }
  0x88   : > { %598 = vmatprep.mubr.msk.f32.mxu0 %vm270_vm0, %v268_v5  ;;  %609 = vmatprep.subr.bf16.mxu0 %v608_v3  ;;  %v260_v8 = vld [vmem:[#allocation2] sm:$0xff]  ;;  %v261_v12 = vld [vmem:[#allocation2 + $0x8] sm:$0xff]  ;;  %v266_v14 = vld [vmem:[#allocation7] sm:$0xff]  ;;  %s815_s27 = scalar_lea.vmem %s1149_s6, 256  ;;  %s897_s30 = smov [#allocation10]  }
  0x89   : > { %611 = vmatpush3.bf16.msra.mxu0 %v608_v3  ;;  %605 = vmatprep.mubr.msk.f32.mxu1 %vm352_vm1, %v260_v8  ;;  %p816_p9 = scmp.ne.s32.totalorder %s1149_s6, %s815_s27  ;;  %s819_s29 = sshll.u32 %s897_s30, 4  ;;  %s820_s29 = int_to_ptr.vmem [resolvable:$false] %s819_s29 }
  0x8a   : > { %613 = vmatprep.subr.bf16.mxu0 %v612_v6  ;;  %s821_s24 = scalar_lea.vmem %s820_s29, 512  ;;  %p822_p12 = scmp.lt.s32.totalorder %s1149_s6, %s820_s29 }
  0x8b   : > { %p817_p3 = pnand %p816_p9, %p1079_p5  ;;  %p823_p1 = scmp.lt.s32.totalorder %s821_s24, %s815_s27 }
  0x8d   : > { %615 = vmatpush3.bf16.msra.mxu0 %v612_v6  ;;  %p818_p7 = pneg %p817_p3  ;;  %p824_p2 = por %p823_p1, %p822_p12 }
  0x8f   : > { %p825_p4 = pnand %p824_p2, %p818_p7 }
  0x90   : > { %599 = vmatmul.mubr.msk.f32.vlgmr.msra.gmra.mrb[0].mxu0 %vm270_vm0, %v269_v7 }
 0x163   : > { %v600_v9 = vpop.f32.mrb[0].mxu0 }
 0x164   : > { %v343_v10 = vpop.f32.mrb[1].mxu0 }
 0x165   : > { %v616_v11 = vpack.c.bf16 %v600_v9, %v343_v10 }
 0x167   : > { %617 = vmatprep.subr.bf16.mxu1 %v616_v11 }
 0x168   : > { %619 = vmatpush3.bf16.msra.mxu1 %v616_v11 }
 0x16b   : > { %606 = vmatmul.mubr.msk.f32.vlgmr.msra.gmra.mrb[0].mxu1 %vm352_vm1, %v261_v12 }
 0x23e   : > { %v607_v15 = vpop.f32.mrb[0].mxu1 }
 0x23f   : > { %v431_v16 = vadd.f32 %v607_v15, %v267_v13  ;;  %v425_v17 = vpop.f32.mrb[1].mxu1 }
 0x240   : > { %v426_v18 = vadd.f32 %v425_v17, %v266_v14 }
 0x241   : > { %435 = vst.msk [vmem:[%s259_s21 + $0x8] sm:$0xff] %vm270_vm0, %v431_v16 }
 0x242   : > { %434 = vst.msk [vmem:[%s259_s21] sm:$0xff] %vm270_vm0, %v426_v18 }
 0x243   : > { %828 = shalt.err (!%p825_p4)
}
 0x244   : > { %s829_s5 = scalar_lea.hbm %s1154_s25, 256  ;;  %s833_s23 = scalar_lea.hbm %s1204_s4, 512 }
 0x245   : > { %p830_p10 = scmp.ne.s32.totalorder %s1154_s25, %s829_s5  ;;  %p834_p13 = scmp.lt.u32.totalorder %s1154_s25, %s1204_s4 }
 0x246   : > { %p835_p6 = scmp.lt.u32.totalorder %s833_s23, %s829_s5  ;;  %p837_p9 = scmp.lt.u32.totalorder %s829_s5, %s1154_s25 }
 0x247   : > { %p831_p0 = pnand %p830_p10, %p1079_p5 }
 0x248   : > { %p836_p11 = por %p835_p6, %p834_p13 }
 0x249   : > { %p832_p8 = pneg %p831_p0 }
 0x24a   : > { %p838_p3 = por %p837_p9, %p836_p11 }
 0x24c   : > { %p839_p7 = pnand %p838_p3, %p832_p8 }
 0x24e   : > { %842 = shalt.err (!%p839_p7)
}
 0x24f   : > { %s898_s21 = smov 128   ;;  %s899_s8 = smov 8  }
 0x250   : > { %634 = dma.vmem_to_hbm [thread:$0]  (%p1079_p5), %s1149_s6, 256, %s1154_s25, %s437_s19, %s898_s21, %s898_s21, %s899_s8  }
 0x251 PF: > { %s465_s28 = sand.u32 1, %s877_s15   ;;  %p1222_p12 = scmp.ne.s32.totalorder %s1209_s22, 0 }
 0x252   : > { %p1223_p1 = scmp.ge.s32.totalorder %s889_s18, 2  ;;  %s466_s11 = scalar_lea.sflag [#allocation4], %s465_s28 }
 0x254   : > { %p651_p2 = pnand %p1223_p1, %p1222_p12 }
 0x256   : > { %872 = dma.done.wait (!%p651_p2), %s466_s11, 256  }
 0x257   : > { %874 = vsyncadd (!%p651_p2), %s466_s11, 4294967040  ;;  %p19_p4 = scmp.ge.s32.totalorder %s1065_s10, 4   ;;  %s1224_s15 = smov %s881_s16 }
 0x258   : > { %s1225_s16 = smov %s885_s17  ;;  %s1226_s17 = smov %s1075_s12 }
 0x259   : > { %s1227_s18 = smov %s1065_s10  ;;  %21 = sbr.rel (!%p19_p4) target bundleno = 7 (0x7), region = 94 }
 0x260   :  { %471 = vsyncpa [#allocation3], 1 }
 0x261   :  { %473 = vsyncpa [#allocation3 + $0x1], 1 }
 0x262   :  { %474 = vsyncpa [#allocation6], 1 }
 0x263   :  { %475 = vsyncpa [#allocation9], 1 }
 0x264   :  { %477 = vsyncpa [#allocation9 + $0x1], 1 }
 0x265   :  { %478 = vsyncpa [#allocation4], 1 }
 0x266   :  { %480 = vsyncpa [#allocation4 + $0x1], 1 }

// kernel: tpu_custom_call.1
= control target key start
LH: loop header
LB: loop body
LE: loop exit
PB: predicated region body
PF: predicated region fallthrough
CT: control target
= control target key end

     0   :  { %9 = vsyncpa [#allocation3], 0  ;;  %s1200_s0 = inlined_call_operand.hbm [shape: f32[16,16], index: 0, kind: input, shape index: {}]   ;;  %s1201_s1 = inlined_call_operand.hbm [shape: f32[32,32], index: 1, kind: input, shape index: {}]   ;;  %s1202_s2 = inlined_call_operand.hbm [shape: f32[16,32], index: 2, kind: input, shape index: {}]   ;;  %s1203_s3 = inlined_call_operand.hbm [shape: f32[2,16,32], index: 3, kind: input, shape index: {}]   ;;  %s1204_s4 = inlined_call_operand.hbm [shape: f32[2,16,32], index: 4, kind: output, shape index: {}]  }
   0x1   :  { %10 = vsyncpa [#allocation6], 0 }
   0x2   :  { %11 = vsyncpa [#allocation9], 0 }
   0x3   :  { %13 = vsyncpa [#allocation9 + $0x1], 0 }
   0x4   :  { %14 = vsyncpa [#allocation4], 0 }
   0x5   :  { %16 = vsyncpa [#allocation4 + $0x1], 0  ;;  %s925_s15 = smov 0   ;;  %s927_s16 = smov 0  }
   0x6   :  { %s929_s17 = smov 0   ;;  %s931_s18 = smov 0  }
   0x7 LB: > { %s946_s19 = sadd.s32 4294967295, %s889_s18   ;;  %s554_s20 = sadd.s32 4294967294, %s889_s18   ;;  %s889_s18 = sphi %s931_s18, %s1227_s18   ;;  %s885_s17 = sphi %s929_s17, %s1226_s17   ;;  %s881_s16 = sphi %s927_s16, %s1225_s16   ;;  %s877_s15 = sphi %s925_s15, %s1224_s15  }
   0x8   : > { %p105_p0 = scmp.ne.s32.totalorder %s881_s16, %s877_s15  ;;  %p1205_p1 = scmp.eq.s32.totalorder %s946_s19, 0 }
   0x9   : > { %p135_p3 = scmp.eq.s32.totalorder %s554_s20, 1  ;;  %p555_p5 = scmp.ge.s32.totalorder %s889_s18, 1 }
   0xa   : > { %p955_p4 = por %p1205_p1, %p105_p0  ;;  %p142_p7 = scmp.lt.s32.totalorder %s889_s18, 3 }
   0xb   : > { %p960_p6 = por %p135_p3, %p105_p0  ;;  %s891_s24 = smov [#allocation5]  }
   0xc   : > { %s1208_s21 = scalar_select %p955_p4, 1, 0 }
   0xd   : > { %s1209_s22 = scalar_select %p960_p6, 1, 0 }
   0xe   : > { %p965_p8 = pnand %p555_p5, %p142_p7  ;;  %s167_s25 = sshll.u32 %s891_s24, 4  ;;  %s972_s25 = int_to_ptr.vmem [resolvable:$true] %s167_s25 }
   0xf   : > { %s892_s27 = smov [#allocation2]   ;;  %s893_s29 = smov [#allocation7]  }
  0x10   : > { %s1210_s23 = scalar_select %p965_p8, 1, 0 }
  0x11   : > { %p636_p10 = pneg %p965_p8  ;;  %s154_s28 = sshll.u32 %s892_s27, 4  ;;  %s980_s28 = int_to_ptr.vmem [resolvable:$true] %s154_s28 }
  0x12   : > { %s982_s30 = sshll.u32 %s893_s29, 4  ;;  %s701_s7 = scalar_lea.hbm %s1201_s1, 512  ;;  %s181_s30 = int_to_ptr.vmem [resolvable:$true] %s982_s30 }
  0x13   : > { %p976_p11 = pnand %p636_p10, %p1205_p1  ;;  %p702_p12 = scmp.ne.s32.totalorder %s1201_s1, %s701_s7 }
  0x14   : > { %p708_p5 = scmp.lt.u32.totalorder %s701_s7, %s1201_s1 }
  0x15   : > { %p992_p13 = pneg %p976_p11 }
  0x17   : > { %p704_p0 = pnand %p992_p13, %p702_p12 }
  0x19   : > { %p705_p3 = pneg %p704_p0 }
  0x1b   : > { %p710_p7 = pnand %p708_p5, %p705_p3 }
  0x1d   : > { %713 = shalt.err (!%p710_p7)
}
  0x1e   : > { %s714_s13 = scalar_lea.vmem %s972_s25, 512  ;;  %p722_p2 = scmp.lt.s32.totalorder %s972_s25, %s972_s25 }
  0x1f   : > { %p715_p10 = scmp.ne.s32.totalorder %s972_s25, %s714_s13  ;;  %p723_p6 = scmp.lt.s32.totalorder %s714_s13, %s714_s13 }
  0x21   : > { %p717_p9 = pnand %p715_p10, %p992_p13  ;;  %p724_p12 = por %p723_p6, %p722_p2 }
  0x23   : > { %p718_p1 = pneg %p717_p9 }
  0x25   : > { %p725_p0 = pnand %p724_p12, %p718_p1 }
  0x27   : > { %728 = shalt.err (!%p725_p0)
}
  0x28   : > { %s894_s14 = smov 128   ;;  %s895_s20 = smov 8  }
  0x29   : > { %642 = dma.hbm_to_vmem [thread:$0]  (!%p976_p11), %s1201_s1, 512, %s972_s25, [#allocation6], %s894_s14, %s894_s14, %s895_s20  }
  0x2a   : > { %s729_s6 = scalar_lea.hbm %s1200_s0, 256 }
  0x2b   : > { %p730_p1 = scmp.ne.s32.totalorder %s1200_s0, %s729_s6  ;;  %p736_p9 = scmp.lt.u32.totalorder %s729_s6, %s1200_s0 }
  0x2d   : > { %p732_p2 = pnand %p730_p1, %p992_p13 }
  0x2f   : > { %p733_p6 = pneg %p732_p2 }
  0x31   : > { %p738_p3 = pnand %p736_p9, %p733_p6 }
  0x33   : > { %741 = shalt.err (!%p738_p3)
}
  0x34   : > { %s742_s25 = scalar_lea.vmem %s980_s28, 256  ;;  %p750_p12 = scmp.lt.s32.totalorder %s980_s28, %s980_s28 }
  0x35   : > { %p743_p5 = scmp.ne.s32.totalorder %s980_s28, %s742_s25  ;;  %p751_p0 = scmp.lt.s32.totalorder %s742_s25, %s742_s25 }
  0x37   : > { %p745_p7 = pnand %p743_p5, %p992_p13  ;;  %p752_p1 = por %p751_p0, %p750_p12 }
  0x39   : > { %p746_p10 = pneg %p745_p7 }
  0x3b   : > { %p753_p2 = pnand %p752_p1, %p746_p10 }
  0x3d   : > { %756 = shalt.err (!%p753_p2)
}
  0x3e   : > { %639 = dma.hbm_to_vmem [thread:$0]  (!%p976_p11), %s1200_s0, 256, %s980_s28, [#allocation3], %s894_s14, %s894_s14, %s895_s20  }
  0x3f   : > { %s757_s29 = scalar_lea.hbm %s1202_s2, 256 }
  0x40   : > { %p758_p6 = scmp.ne.s32.totalorder %s1202_s2, %s757_s29  ;;  %p764_p5 = scmp.lt.u32.totalorder %s757_s29, %s1202_s2 }
  0x42   : > { %p760_p9 = pnand %p758_p6, %p992_p13 }
  0x44   : > { %p761_p3 = pneg %p760_p9 }
  0x46   : > { %p766_p7 = pnand %p764_p5, %p761_p3 }
  0x48   : > { %769 = shalt.err (!%p766_p7)
}
  0x49   : > { %s770_s9 = scalar_lea.vmem %s181_s30, 256  ;;  %p778_p1 = scmp.lt.s32.totalorder %s181_s30, %s181_s30 }
  0x4a   : > { %p771_p10 = scmp.ne.s32.totalorder %s181_s30, %s770_s9  ;;  %p779_p2 = scmp.lt.s32.totalorder %s770_s9, %s770_s9 }
  0x4c   : > { %p773_p12 = pnand %p771_p10, %p992_p13  ;;  %p780_p4 = por %p779_p2, %p778_p1 }
  0x4e   : > { %p774_p0 = pneg %p773_p12 }
  0x50   : > { %p781_p8 = pnand %p780_p4, %p774_p0 }
  0x52   : > { %784 = shalt.err (!%p781_p8)
}
  0x53   : > { %645 = dma.hbm_to_vmem [thread:$0]  (!%p976_p11), %s1202_s2, 256, %s181_s30, [#allocation6], %s894_s14, %s894_s14, %s895_s20  }
  0x54   : > { %s1065_s10 = sadd.s32 1, %s889_s18   ;;  %s92_s25 = sadd.s32 1, %s885_s17 }
  0x55   : > { %s89_s26 = ssub.s32 %s889_s18, %s1065_s10  ;;  %p99_p8 = scmp.ne.s32.totalorder %s885_s17, %s881_s16 }
  0x56   : > { %p90_p4 = scmp.eq.s32.totalorder %s89_s26, 0  ;;  %p100_p13 = scmp.eq.s32.totalorder %s889_s18, 0 }
  0x57   : > { %p657_p6 = scmp.lt.s32.totalorder %s889_s18, 2  ;;  %p1213_p3 = scmp.eq.s32.totalorder %s946_s19, 1 }
  0x58   : > { %s1075_s12 = scalar_select %p90_p4, %s885_s17, %s92_s25  }
  0x59   : > { %p101_p9 = por %p100_p13, %p99_p8  ;;  %p1079_p5 = por %p1213_p3, %p99_p8 }
  0x5a   : > { %s194_s24 = sand.u32 1, %s885_s17   ;;  %s578_s27 = sshll.u32 %s889_s18, 8 }
  0x5b   : > { %s560_s30 = sshll.u32 %s194_s24, 4  ;;  %s1088_s6 = scalar_lea.hbm %s1203_s3, %s578_s27 }
  0x5c   : > { %s198_s7 = scalar_lea.vmem [#allocation8], %s560_s30  ;;  %p1090_p11 = pnand %p657_p6, %p101_p9 }
  0x5d   : > { %s205_s8 = sshll.u32 %s198_s7, 4  ;;  %s1096_s28 = scalar_lea.sflag [#allocation9], %s194_s24  ;;  %s1094_s8 = int_to_ptr.vmem [resolvable:$true] %s205_s8 }
  0x5e   : > { %s785_s11 = scalar_lea.hbm %s1088_s6, 256  ;;  %p787_p10 = pneg %p1090_p11 }
  0x5f   : > { %p786_p7 = scmp.ne.s32.totalorder %s1088_s6, %s785_s11  ;;  %s790_s27 = scalar_lea.hbm %s1203_s3, 512 }
  0x60   : > { %p791_p1 = scmp.lt.u32.totalorder %s1088_s6, %s1203_s3  ;;  %p792_p2 = scmp.lt.u32.totalorder %s790_s27, %s785_s11 }
  0x61   : > { %p788_p12 = pnand %p787_p10, %p786_p7  ;;  %p794_p8 = scmp.lt.u32.totalorder %s785_s11, %s1088_s6 }
  0x62   : > { %p793_p4 = por %p792_p2, %p791_p1 }
  0x63   : > { %p789_p0 = pneg %p788_p12 }
  0x64   : > { %p795_p13 = por %p794_p8, %p793_p4 }
  0x66   : > { %p796_p6 = pnand %p795_p13, %p789_p0 }
  0x68   : > { %799 = shalt.err (!%p796_p6)
}
  0x69   : > { %s800_s24 = scalar_lea.vmem %s1094_s8, 256  ;;  %s896_s5 = smov [#allocation8]  }
  0x6a   : > { %p801_p9 = scmp.ne.s32.totalorder %s1094_s8, %s800_s24  ;;  %s805_s7 = sshll.u32 %s896_s5, 4  ;;  %s806_s7 = int_to_ptr.vmem [resolvable:$false] %s805_s7 }
  0x6b   : > { %s807_s26 = scalar_lea.vmem %s806_s7, 512  ;;  %p808_p12 = scmp.lt.s32.totalorder %s1094_s8, %s806_s7 }
  0x6c   : > { %p803_p3 = pnand %p801_p9, %p787_p10  ;;  %p809_p1 = scmp.lt.s32.totalorder %s807_s26, %s800_s24 }
  0x6e   : > { %p804_p7 = pneg %p803_p3  ;;  %p810_p2 = por %p809_p1, %p808_p12 }
  0x70   : > { %p811_p4 = pnand %p810_p2, %p804_p7 }
  0x72   : > { %814 = shalt.err (!%p811_p4)
}
  0x73   : > { %649 = dma.hbm_to_vmem [thread:$0]  (!%p1090_p11), %s1088_s6, 256, %s1094_s8, %s1096_s28, %s894_s14, %s894_s14, %s895_s20  }
  0x74   : > { %p1216_p10 = scmp.ne.s32.totalorder %s1210_s23, 0 }
  0x75   : > { %p1217_p0 = scmp.eq.s32.totalorder (!%p1216_p10), %s946_s19, 0 }
  0x76   : > { %217 = sbr.rel (%p1216_p10) target bundleno = 593 (0x251), region = 36 }
  0x7d   : > { %860 = dma.done.wait (%p1217_p0), [#allocation3], 256   ;;  %p1218_p8 = pmov %p1217_p0 }
  0x7e   : > { %p1219_p13 = pmov %p1217_p0 }
  0x7f   : > { %862 = vsyncadd (%p1218_p8), [#allocation3], 4294967040 }
  0x80   : > { %864 = dma.done.wait (%p1219_p13), [#allocation6], 768   ;;  %p1220_p6 = pmov %p1217_p0 }
  0x81   : > { %s1138_s9 = sand.u32 1, %s881_s16   ;;  %p1221_p11 = scmp.ne.s32.totalorder %s1208_s21, 0 }
  0x82   : > { %866 = vsyncadd (%p1220_p6), [#allocation6], 4294966528  ;;  %s567_s23 = sshll.u32 %s1138_s9, 4  ;;  %s232_s14 = scalar_lea.sflag [#allocation9], %s1138_s9 }
  0x83   : > { %s235_s20 = scalar_lea.vmem [#allocation8], %s567_s23 }
  0x84   : > { %868 = dma.done.wait (%p1221_p11), %s232_s14, 256  }
  0x85   : > { %870 = vsyncadd (%p1221_p11), %s232_s14, 4294967040  ;;  %vm270_vm0 = vcmask 261120   ;;  %v262_v0 = vld [vmem:[#allocation5] sm:$0xff]  ;;  %v263_v1 = vld [vmem:[#allocation5 + $0x8] sm:$0xff]  ;;  %vm352_vm1 = vcmask 130048   ;;  %s259_s21 = scalar_lea.vmem [#allocation10], %s567_s23 }
  0x86   : > { %v264_v2 = vld [vmem:[#allocation5 + $0x10] sm:$0xff]  ;;  %v608_v3 = vpack.c.bf16 %v263_v1, %v262_v0  ;;  %v265_v4 = vld [vmem:[#allocation5 + $0x18] sm:$0xff]  ;;  %s450_s6 = sshll.u32 %s259_s21, 4  ;;  %v267_v13 = vld [vmem:[#allocation7 + $0x8] sm:$0xff]  ;;  %s579_s8 = sshll.u32 %s946_s19, 8  ;;  %s1149_s6 = int_to_ptr.vmem [resolvable:$true] %s450_s6 }
  0x87   : > { %v268_v5 = vld [vmem:[%s235_s20] sm:$0xff]  ;;  %v612_v6 = vpack.c.bf16 %v265_v4, %v264_v2  ;;  %v269_v7 = vld [vmem:[%s235_s20 + $0x8] sm:$0xff]  ;;  %s1154_s25 = scalar_lea.hbm %s1204_s4, %s579_s8  ;;  %s437_s19 = scalar_lea.sflag [#allocation4], %s1138_s9 }
  0x88   : > { %598 = vmatprep.mubr.msk.f32.mxu0 %vm270_vm0, %v268_v5  ;;  %609 = vmatprep.subr.bf16.mxu0 %v608_v3  ;;  %v260_v8 = vld [vmem:[#allocation2] sm:$0xff]  ;;  %v261_v12 = vld [vmem:[#allocation2 + $0x8] sm:$0xff]  ;;  %v266_v14 = vld [vmem:[#allocation7] sm:$0xff]  ;;  %s815_s27 = scalar_lea.vmem %s1149_s6, 256  ;;  %s897_s30 = smov [#allocation10]  }
  0x89   : > { %611 = vmatpush3.bf16.msra.mxu0 %v608_v3  ;;  %605 = vmatprep.mubr.msk.f32.mxu1 %vm352_vm1, %v260_v8  ;;  %p816_p9 = scmp.ne.s32.totalorder %s1149_s6, %s815_s27  ;;  %s819_s29 = sshll.u32 %s897_s30, 4  ;;  %s820_s29 = int_to_ptr.vmem [resolvable:$false] %s819_s29 }
  0x8a   : > { %613 = vmatprep.subr.bf16.mxu0 %v612_v6  ;;  %s821_s24 = scalar_lea.vmem %s820_s29, 512  ;;  %p822_p12 = scmp.lt.s32.totalorder %s1149_s6, %s820_s29 }
  0x8b   : > { %p817_p3 = pnand %p816_p9, %p1079_p5  ;;  %p823_p1 = scmp.lt.s32.totalorder %s821_s24, %s815_s27 }
  0x8d   : > { %615 = vmatpush3.bf16.msra.mxu0 %v612_v6  ;;  %p818_p7 = pneg %p817_p3  ;;  %p824_p2 = por %p823_p1, %p822_p12 }
  0x8f   : > { %p825_p4 = pnand %p824_p2, %p818_p7 }
  0x90   : > { %599 = vmatmul.mubr.msk.f32.vlgmr.msra.gmra.mrb[0].mxu0 %vm270_vm0, %v269_v7 }
 0x163   : > { %v600_v9 = vpop.f32.mrb[0].mxu0 }
 0x164   : > { %v343_v10 = vpop.f32.mrb[1].mxu0 }
 0x165   : > { %v616_v11 = vpack.c.bf16 %v600_v9, %v343_v10 }
 0x167   : > { %617 = vmatprep.subr.bf16.mxu1 %v616_v11 }
 0x168   : > { %619 = vmatpush3.bf16.msra.mxu1 %v616_v11 }
 0x16b   : > { %606 = vmatmul.mubr.msk.f32.vlgmr.msra.gmra.mrb[0].mxu1 %vm352_vm1, %v261_v12 }
 0x23e   : > { %v607_v15 = vpop.f32.mrb[0].mxu1 }
 0x23f   : > { %v431_v16 = vadd.f32 %v607_v15, %v267_v13  ;;  %v425_v17 = vpop.f32.mrb[1].mxu1 }
 0x240   : > { %v426_v18 = vadd.f32 %v425_v17, %v266_v14 }
 0x241   : > { %435 = vst.msk [vmem:[%s259_s21 + $0x8] sm:$0xff] %vm270_vm0, %v431_v16 }
 0x242   : > { %434 = vst.msk [vmem:[%s259_s21] sm:$0xff] %vm270_vm0, %v426_v18 }
 0x243   : > { %828 = shalt.err (!%p825_p4)
}
 0x244   : > { %s829_s5 = scalar_lea.hbm %s1154_s25, 256  ;;  %s833_s23 = scalar_lea.hbm %s1204_s4, 512 }
 0x245   : > { %p830_p10 = scmp.ne.s32.totalorder %s1154_s25, %s829_s5  ;;  %p834_p13 = scmp.lt.u32.totalorder %s1154_s25, %s1204_s4 }
 0x246   : > { %p835_p6 = scmp.lt.u32.totalorder %s833_s23, %s829_s5  ;;  %p837_p9 = scmp.lt.u32.totalorder %s829_s5, %s1154_s25 }
 0x247   : > { %p831_p0 = pnand %p830_p10, %p1079_p5 }
 0x248   : > { %p836_p11 = por %p835_p6, %p834_p13 }
 0x249   : > { %p832_p8 = pneg %p831_p0 }
 0x24a   : > { %p838_p3 = por %p837_p9, %p836_p11 }
 0x24c   : > { %p839_p7 = pnand %p838_p3, %p832_p8 }
 0x24e   : > { %842 = shalt.err (!%p839_p7)
}
 0x24f   : > { %s898_s21 = smov 128   ;;  %s899_s8 = smov 8  }
 0x250   : > { %634 = dma.vmem_to_hbm [thread:$0]  (%p1079_p5), %s1149_s6, 256, %s1154_s25, %s437_s19, %s898_s21, %s898_s21, %s899_s8  }
 0x251 PF: > { %s465_s28 = sand.u32 1, %s877_s15   ;;  %p1222_p12 = scmp.ne.s32.totalorder %s1209_s22, 0 }
 0x252   : > { %p1223_p1 = scmp.ge.s32.totalorder %s889_s18, 2  ;;  %s466_s11 = scalar_lea.sflag [#allocation4], %s465_s28 }
 0x254   : > { %p651_p2 = pnand %p1223_p1, %p1222_p12 }
 0x256   : > { %872 = dma.done.wait (!%p651_p2), %s466_s11, 256  }
 0x257   : > { %874 = vsyncadd (!%p651_p2), %s466_s11, 4294967040  ;;  %p19_p4 = scmp.ge.s32.totalorder %s1065_s10, 4   ;;  %s1224_s15 = smov %s881_s16 }
 0x258   : > { %s1225_s16 = smov %s885_s17  ;;  %s1226_s17 = smov %s1075_s12 }
 0x259   : > { %s1227_s18 = smov %s1065_s10  ;;  %21 = sbr.rel (!%p19_p4) target bundleno = 7 (0x7), region = 94 }
 0x260   :  { %471 = vsyncpa [#allocation3], 1 }
 0x261   :  { %473 = vsyncpa [#allocation3 + $0x1], 1 }
 0x262   :  { %474 = vsyncpa [#allocation6], 1 }
 0x263   :  { %475 = vsyncpa [#allocation9], 1 }
 0x264   :  { %477 = vsyncpa [#allocation9 + $0x1], 1 }
 0x265   :  { %478 = vsyncpa [#allocation4], 1 }
 0x266   :  { %480 = vsyncpa [#allocation4 + $0x1], 1 }

</bundles_post_ra>
